<compile_context>
chip_gen: v6e
topology: v6e:2x2x1
jax: 0.10.0
libtpu: 0.0.40
codegen_flags: <defaults>
</compile_context>

<pallas_src>
import jax
import jax.numpy as jnp
from jax.experimental import pallas as pl
from jax.experimental.pallas import tpu as pltpu

_NEG = -1e30  # large negative finite value (avoids -inf -> NaN in online updates)


def clip_loss_kernel(n_ref, scale_ref, img_ref, txt_ref, loss_ref,
                     m_r_ref, l_r_ref, m_c_ref, l_c_ref, acc_ref):
    i = pl.program_id(0)          # row-tile index (outer)
    j = pl.program_id(1)          # col-tile index (inner)
    ni = pl.num_programs(0)
    nj = pl.num_programs(1)

    n = n_ref[0]                  # true (unpadded) batch size
    scale = scale_ref[0]          # logit_scale

    tm = img_ref.shape[0]
    tn = txt_ref.shape[0]

    # Global row / column indices of this tile (for padding masks).
    row_ids = i * tm + jax.lax.broadcasted_iota(jnp.int32, (tm, 1), 0)
    col_ids = j * tn + jax.lax.broadcasted_iota(jnp.int32, (1, tn), 1)
    row_valid = row_ids < n                       # (tm, 1)
    col_valid = col_ids < n                       # (1, tn)

    # ---------------- init accumulators ----------------
    @pl.when(jnp.logical_and(i == 0, j == 0))
    def _init_acc():
        acc_ref[...] = jnp.zeros((1, 1), jnp.float32)

    @pl.when(j == 0)
    def _init_row_stats():
        m_r_ref[...] = jnp.full((tm, 1), _NEG, jnp.float32)
        l_r_ref[...] = jnp.zeros((tm, 1), jnp.float32)

    @pl.when(i == 0)
    def _init_col_stats():
        m_c_ref[j] = jnp.full((1, tn), _NEG, jnp.float32)
        l_c_ref[j] = jnp.zeros((1, tn), jnp.float32)

    # ---------------- logits tile (MXU, native dtype -> f32 accumulate) -------
    logits = jax.lax.dot_general(
        img_ref[...], txt_ref[...],
        dimension_numbers=(((1,), (1,)), ((), ())),
        preferred_element_type=jnp.float32) * scale            # (tm, tn) f32

    valid = jnp.logical_and(row_valid, col_valid)
    lg = jnp.where(valid, logits, _NEG)

    # ---------------- diagonal (target logits): only diagonal tiles ----------
    @pl.when(i == j)
    def _diag():
        rr = jax.lax.broadcasted_iota(jnp.int32, logits.shape, 0)
        cc = jax.lax.broadcasted_iota(jnp.int32, logits.shape, 1)
        d = jnp.where(jnp.logical_and(rr == cc, row_valid), logits, 0.0)
        dsum = jnp.sum(jnp.sum(d, axis=1, keepdims=True), axis=0, keepdims=True)
        acc_ref[...] = acc_ref[...] - 2.0 * dsum

    # ---------------- online row logsumexp (image -> text CE) ----------------
    m_prev = m_r_ref[...]
    m_new = jnp.maximum(m_prev, jnp.max(lg, axis=1, keepdims=True))
    e_row = jnp.exp(lg - m_new)
    l_r_ref[...] = (l_r_ref[...] * jnp.exp(m_prev - m_new)
                    + jnp.sum(e_row, axis=1, keepdims=True))
    m_r_ref[...] = m_new

    # ---------------- online column logsumexp (text -> image CE) -------------
    mc_prev = m_c_ref[j]
    mc_new = jnp.maximum(mc_prev, jnp.max(lg, axis=0, keepdims=True))
    e_col = jnp.exp(lg - mc_new)
    l_c_ref[j] = (l_c_ref[j] * jnp.exp(mc_prev - mc_new)
                  + jnp.sum(e_col, axis=0, keepdims=True))
    m_c_ref[j] = mc_new

    # ---------------- finalize ------------------------------------------------
    @pl.when(j == nj - 1)
    def _row_final():
        lse_r = m_r_ref[...] + jnp.log(l_r_ref[...])
        lse_r = jnp.where(row_valid, lse_r, 0.0)
        acc_ref[...] = acc_ref[...] + jnp.sum(lse_r, axis=0, keepdims=True)

    @pl.when(i == ni - 1)
    def _col_final():
        lse_c = m_c_ref[j] + jnp.log(l_c_ref[j])
        lse_c = jnp.where(col_valid, lse_c, 0.0)
        acc_ref[...] = acc_ref[...] + jnp.sum(lse_c, axis=1, keepdims=True)

    @pl.when(jnp.logical_and(i == ni - 1, j == nj - 1))
    def _write_out():
        loss_ref[...] = 0.5 * acc_ref[...] / n.astype(jnp.float32)


def _round_up(x, m):
    return ((x + m - 1) // m) * m


def clip_loss(image_features, text_features, logit_scale, *, block_n=128):
    """Single-device (world_size == 1) ClipLoss forward. Returns scalar f32 loss.

    block_n: batch tile size (row == column tile). 128 is safe on v5e/v6e/v7x;
    raise to 256/512 on v6e (128 MiB VMEM) for higher HBM-roofline utilization.
    """
    assert image_features.shape == text_features.shape
    n, d = image_features.shape

    # Tile size along the batch axis (same for rows and columns so diagonal
    # tiles land at i == j).  Pad N with zero rows; padding is masked in-kernel.
    tile = min(block_n, _round_up(n, 8))
    n_pad = _round_up(n, tile)
    if n_pad != n:
        pad = ((0, n_pad - n), (0, 0))
        image_features = jnp.pad(image_features, pad)
        text_features = jnp.pad(text_features, pad)

    nt = n_pad // tile
    grid = (nt, nt)

    n_arr = jnp.asarray([n], jnp.int32)
    scale_arr = jnp.asarray(logit_scale, jnp.float32).reshape((1,))

    kernel = pl.pallas_call(
        clip_loss_kernel,
        out_shape=jax.ShapeDtypeStruct((1, 1), jnp.float32),
        grid_spec=pltpu.PrefetchScalarGridSpec(
            num_scalar_prefetch=2,            # n, logit_scale -> SMEM
            grid=grid,
            in_specs=[
                pl.BlockSpec((tile, d), lambda i, j, n_s, sc: (i, 0)),  # image rows
                pl.BlockSpec((tile, d), lambda i, j, n_s, sc: (j, 0)),  # text rows
            ],
            out_specs=pl.BlockSpec((1, 1), lambda i, j, n_s, sc: (0, 0)),
            scratch_shapes=[
                pltpu.VMEM((tile, 1), jnp.float32),       # m_r (row running max)
                pltpu.VMEM((tile, 1), jnp.float32),       # l_r (row running sum)
                pltpu.VMEM((nt, 1, tile), jnp.float32),   # m_c (col running max, persistent)
                pltpu.VMEM((nt, 1, tile), jnp.float32),   # l_c (col running sum, persistent)
                pltpu.VMEM((1, 1), jnp.float32),          # scalar loss accumulator
            ],
        ),
        # Both axes carry accumulator state (acc / column stats across i, row
        # stats across j) -> must be "arbitrary" (sequential), not "parallel".
        compiler_params=pltpu.CompilerParams(
            dimension_semantics=("arbitrary", "arbitrary")),
    )
    out = kernel(n_arr, scale_arr, image_features, text_features)
    return out[0, 0]


if __name__ == "__main__":
    key = jax.random.PRNGKey(0)
    k_img, k_txt = jax.random.split(key)

    # Small shapes; N=12 with block_n=8 exercises a 2x2 tile grid + padding mask.
    N, D = 12, 32
    image_features = jax.random.normal(k_img, (N, D), jnp.float32)
    text_features = jax.random.normal(k_txt, (N, D), jnp.float32)
    # CLIP features are L2-normalized before the loss.
    image_features = image_features / jnp.linalg.norm(image_features, axis=-1, keepdims=True)
    text_features = text_features / jnp.linalg.norm(text_features, axis=-1, keepdims=True)
    # Deterministic logit_scale (CLIP's standard init: exp(log(1/0.07))).
    logit_scale = jnp.exp(jnp.log(jnp.float32(1.0 / 0.07)))

    loss = jax.block_until_ready(
        clip_loss(image_features, text_features, logit_scale, block_n=8))

    # Pure-JAX reference for verification.
    logits = logit_scale * image_features @ text_features.T

    def ce(lg):
        lse = jax.nn.logsumexp(lg, axis=1)
        return jnp.mean(lse - jnp.diagonal(lg))

    ref = 0.5 * (ce(logits) + ce(logits.T))
    assert jnp.allclose(loss, ref, atol=1e-4, rtol=1e-4), (loss, ref)

    print("KERNEL_OK")
</pallas_src>

<mosaic_0001>
module attributes {stable_mosaic.version = 11 : i64} {
  func.func @clip_loss_kernel(%arg0: i32, %arg1: i32, %arg2: memref<1xi32, #tpu.memory_space<smem>>, %arg3: memref<1xf32, #tpu.memory_space<smem>>, %arg4: memref<8x32xf32, #tpu.memory_space<vmem>>, %arg5: memref<8x32xf32, #tpu.memory_space<vmem>>, %arg6: memref<1x1xf32, #tpu.memory_space<vmem>>, %arg7: memref<8x1xf32, #tpu.memory_space<vmem>>, %arg8: memref<8x1xf32, #tpu.memory_space<vmem>>, %arg9: memref<2x1x8xf32, #tpu.memory_space<vmem>>, %arg10: memref<2x1x8xf32, #tpu.memory_space<vmem>>, %arg11: memref<1x1xf32, #tpu.memory_space<vmem>>) attributes {dimension_semantics = [#tpu.dimension_semantics<arbitrary>, #tpu.dimension_semantics<arbitrary>], iteration_bounds = array<i64: 2, 2>, scalar_prefetch = 2 : i64, scratch_operands = 5 : i64, tpu.core_type = #tpu.core_type<tc>, window_params = [{transform_indices = @transform_0, window_bounds = array<i64: 8, 32>}, {transform_indices = @transform_1, window_bounds = array<i64: 8, 32>}, {pipeline_mode = #tpu.pipeline_mode<synchronous>, transform_indices = @transform_2, window_bounds = array<i64: 1, 1>}]} {
    %c0 = arith.constant 0 : index
    %0 = memref.load %arg2[%c0] : memref<1xi32, #tpu.memory_space<smem>>
    %c0_0 = arith.constant 0 : index
    %1 = memref.load %arg3[%c0_0] : memref<1xf32, #tpu.memory_space<smem>>
    %c8_i32 = arith.constant 8 : i32
    %2 = arith.muli %arg0, %c8_i32 : i32
    %3 = tpu.iota {dimensions = array<i32: 0>} : vector<8x1xi32>
    %4 = vector.broadcast %2 : i32 to vector<8x1xi32>
    %5 = arith.addi %4, %3 : vector<8x1xi32>
    %c8_i32_1 = arith.constant 8 : i32
    %6 = arith.muli %arg1, %c8_i32_1 : i32
    %7 = tpu.iota {dimensions = array<i32: 1>} : vector<1x8xi32>
    %8 = vector.broadcast %6 : i32 to vector<1x8xi32>
    %9 = arith.addi %8, %7 : vector<1x8xi32>
    %10 = vector.broadcast %0 : i32 to vector<8x1xi32>
    %11 = arith.cmpi slt, %5, %10 : vector<8x1xi32>
    %12 = vector.broadcast %0 : i32 to vector<1x8xi32>
    %13 = arith.cmpi slt, %9, %12 : vector<1x8xi32>
    %c0_i32 = arith.constant 0 : i32
    %14 = arith.cmpi eq, %arg0, %c0_i32 : i32
    %c0_i32_2 = arith.constant 0 : i32
    %15 = arith.cmpi eq, %arg1, %c0_i32_2 : i32
    %16 = arith.andi %14, %15 : i1
    %17 = arith.extui %16 : i1 to i32
    %c0_i32_3 = arith.constant 0 : i32
    %18 = arith.cmpi ne, %17, %c0_i32_3 : i32
    scf.if %18 {
      %cst_40 = arith.constant 0.000000e+00 : f32
      %91 = vector.broadcast %cst_40 : f32 to vector<1x1xf32>
      %c0_41 = arith.constant 0 : index
      %c0_42 = arith.constant 0 : index
      %92 = vector.load %arg11[%c0_41, %c0_42] : memref<1x1xf32, #tpu.memory_space<vmem>>, vector<1x1xf32>
      tpu.vector_store %arg11[%c0_41, %c0_42], %91 {strides = array<i32>} : memref<1x1xf32, #tpu.memory_space<vmem>>, vector<1x1xf32>,
    } else {
    }
    %c0_i32_4 = arith.constant 0 : i32
    %19 = arith.cmpi eq, %arg1, %c0_i32_4 : i32
    %20 = arith.extui %19 : i1 to i32
    %c0_i32_5 = arith.constant 0 : i32
    %21 = arith.cmpi ne, %20, %c0_i32_5 : i32
    scf.if %21 {
      %cst_40 = arith.constant -1.000000e+30 : f32
      %91 = vector.broadcast %cst_40 : f32 to vector<8x1xf32>
      %c0_41 = arith.constant 0 : index
      %c0_42 = arith.constant 0 : index
      %92 = vector.load %arg7[%c0_41, %c0_42] : memref<8x1xf32, #tpu.memory_space<vmem>>, vector<8x1xf32>
      tpu.vector_store %arg7[%c0_41, %c0_42], %91 {strides = array<i32>} : memref<8x1xf32, #tpu.memory_space<vmem>>, vector<8x1xf32>,
      %cst_43 = arith.constant 0.000000e+00 : f32
      %93 = vector.broadcast %cst_43 : f32 to vector<8x1xf32>
      %c0_44 = arith.constant 0 : index
      %c0_45 = arith.constant 0 : index
      %94 = vector.load %arg8[%c0_44, %c0_45] : memref<8x1xf32, #tpu.memory_space<vmem>>, vector<8x1xf32>
      tpu.vector_store %arg8[%c0_44, %c0_45], %93 {strides = array<i32>} : memref<8x1xf32, #tpu.memory_space<vmem>>, vector<8x1xf32>,
    } else {
    }
    %c0_i32_6 = arith.constant 0 : i32
    %22 = arith.cmpi eq, %arg0, %c0_i32_6 : i32
    %23 = arith.extui %22 : i1 to i32
    %c0_i32_7 = arith.constant 0 : i32
    %24 = arith.cmpi ne, %23, %c0_i32_7 : i32
    scf.if %24 {
      %cst_40 = arith.constant -1.000000e+30 : f32
      %91 = vector.broadcast %cst_40 : f32 to vector<1x8xf32>
      %92 = arith.index_cast %arg1 : i32 to index
      %c0_41 = arith.constant 0 : index
      %c0_42 = arith.constant 0 : index
      %93 = vector.load %arg9[%92, %c0_41, %c0_42] : memref<2x1x8xf32, #tpu.memory_space<vmem>>, vector<1x1x8xf32>
      %94 = vector.shape_cast %93 : vector<1x1x8xf32> to vector<1x8xf32>
      %95 = vector.shape_cast %91 : vector<1x8xf32> to vector<1x1x8xf32>
      tpu.vector_store %arg9[%92, %c0_41, %c0_42], %95 {strides = array<i32>} : memref<2x1x8xf32, #tpu.memory_space<vmem>>, vector<1x1x8xf32>,
      %cst_43 = arith.constant 0.000000e+00 : f32
      %96 = vector.broadcast %cst_43 : f32 to vector<1x8xf32>
      %97 = arith.index_cast %arg1 : i32 to index
      %c0_44 = arith.constant 0 : index
      %c0_45 = arith.constant 0 : index
      %98 = vector.load %arg10[%97, %c0_44, %c0_45] : memref<2x1x8xf32, #tpu.memory_space<vmem>>, vector<1x1x8xf32>
      %99 = vector.shape_cast %98 : vector<1x1x8xf32> to vector<1x8xf32>
      %100 = vector.shape_cast %96 : vector<1x8xf32> to vector<1x1x8xf32>
      tpu.vector_store %arg10[%97, %c0_44, %c0_45], %100 {strides = array<i32>} : memref<2x1x8xf32, #tpu.memory_space<vmem>>, vector<1x1x8xf32>,
    } else {
    }
    %c0_8 = arith.constant 0 : index
    %c0_9 = arith.constant 0 : index
    %25 = vector.load %arg4[%c0_8, %c0_9] : memref<8x32xf32, #tpu.memory_space<vmem>>, vector<8x32xf32>
    %c0_10 = arith.constant 0 : index
    %c0_11 = arith.constant 0 : index
    %26 = vector.load %arg5[%c0_10, %c0_11] : memref<8x32xf32, #tpu.memory_space<vmem>>, vector<8x32xf32>
    %cst = arith.constant dense<0.000000e+00> : vector<8x8xf32>
    %27 = tpu.matmul %25, %26, %cst {dimension_numbers = #tpu.dot_dimension_numbers<[1], [1], [0], [0], [0, 0, 1, 0], [], []>} : vector<8x32xf32>, vector<8x32xf32>, vector<8x8xf32> -> vector<8x8xf32>
    %28 = vector.broadcast %1 : f32 to vector<8x8xf32>
    %29 = arith.mulf %27, %28 : vector<8x8xf32>
    %30 = vector.broadcast %11 : vector<8x1xi1> to vector<8x8xi1>
    %31 = vector.broadcast %13 : vector<1x8xi1> to vector<8x8xi1>
    %32 = arith.andi %30, %31 : vector<8x8xi1>
    %cst_12 = arith.constant -1.000000e+30 : f32
    %33 = vector.broadcast %cst_12 : f32 to vector<8x8xf32>
    %34 = arith.select %32, %29, %33 : vector<8x8xi1>, vector<8x8xf32>
    %35 = arith.cmpi eq, %arg0, %arg1 : i32
    %36 = arith.extui %35 : i1 to i32
    %c0_i32_13 = arith.constant 0 : i32
    %37 = arith.cmpi ne, %36, %c0_i32_13 : i32
    scf.if %37 {
      %91 = tpu.iota {dimensions = array<i32: 0>} : vector<8x8xi32>
      %92 = tpu.iota {dimensions = array<i32: 1>} : vector<8x8xi32>
      %93 = arith.cmpi eq, %91, %92 : vector<8x8xi32>
      %94 = vector.broadcast %11 : vector<8x1xi1> to vector<8x8xi1>
      %95 = arith.andi %93, %94 : vector<8x8xi1>
      %cst_40 = arith.constant 0.000000e+00 : f32
      %96 = vector.broadcast %cst_40 : f32 to vector<8x8xf32>
      %97 = arith.select %95, %29, %96 : vector<8x8xi1>, vector<8x8xf32>
      %cst_41 = arith.constant dense<0.000000e+00> : vector<8xf32>
      %98 = vector.multi_reduction <add>, %97, %cst_41 [1] : vector<8x8xf32> to vector<8xf32>
      %99 = vector.shape_cast %98 : vector<8xf32> to vector<8x1xf32>
      %cst_42 = arith.constant dense<0.000000e+00> : vector<1xf32>
      %100 = vector.multi_reduction <add>, %99, %cst_42 [0] : vector<8x1xf32> to vector<1xf32>
      %101 = vector.shape_cast %100 : vector<1xf32> to vector<1x1xf32>
      %c0_43 = arith.constant 0 : index
      %c0_44 = arith.constant 0 : index
      %102 = vector.load %arg11[%c0_43, %c0_44] : memref<1x1xf32, #tpu.memory_space<vmem>>, vector<1x1xf32>
      %cst_45 = arith.constant 2.000000e+00 : f32
      %103 = vector.broadcast %cst_45 : f32 to vector<1x1xf32>
      %104 = arith.mulf %103, %101 : vector<1x1xf32>
      %105 = arith.subf %102, %104 : vector<1x1xf32>
      %c0_46 = arith.constant 0 : index
      %c0_47 = arith.constant 0 : index
      %106 = vector.load %arg11[%c0_46, %c0_47] : memref<1x1xf32, #tpu.memory_space<vmem>>, vector<1x1xf32>
      tpu.vector_store %arg11[%c0_46, %c0_47], %105 {strides = array<i32>} : memref<1x1xf32, #tpu.memory_space<vmem>>, vector<1x1xf32>,
    } else {
    }
    %c0_14 = arith.constant 0 : index
    %c0_15 = arith.constant 0 : index
    %38 = vector.load %arg7[%c0_14, %c0_15] : memref<8x1xf32, #tpu.memory_space<vmem>>, vector<8x1xf32>
    %cst_16 = arith.constant dense<0xFF800000> : vector<8xf32>
    %39 = vector.multi_reduction <maximumf>, %34, %cst_16 [1] : vector<8x8xf32> to vector<8xf32>
    %40 = vector.shape_cast %39 : vector<8xf32> to vector<8x1xf32>
    %41 = arith.maximumf %38, %40 : vector<8x1xf32>
    %42 = vector.broadcast %41 : vector<8x1xf32> to vector<8x8xf32>
    %43 = arith.subf %34, %42 : vector<8x8xf32>
    %44 = math.exp %43 : vector<8x8xf32>
    %c0_17 = arith.constant 0 : index
    %c0_18 = arith.constant 0 : index
    %45 = vector.load %arg8[%c0_17, %c0_18] : memref<8x1xf32, #tpu.memory_space<vmem>>, vector<8x1xf32>
    %46 = arith.subf %38, %41 : vector<8x1xf32>
    %47 = math.exp %46 : vector<8x1xf32>
    %48 = arith.mulf %45, %47 : vector<8x1xf32>
    %cst_19 = arith.constant dense<0.000000e+00> : vector<8xf32>
    %49 = vector.multi_reduction <add>, %44, %cst_19 [1] : vector<8x8xf32> to vector<8xf32>
    %50 = vector.shape_cast %49 : vector<8xf32> to vector<8x1xf32>
    %51 = arith.addf %48, %50 : vector<8x1xf32>
    %c0_20 = arith.constant 0 : index
    %c0_21 = arith.constant 0 : index
    %52 = vector.load %arg8[%c0_20, %c0_21] : memref<8x1xf32, #tpu.memory_space<vmem>>, vector<8x1xf32>
    tpu.vector_store %arg8[%c0_20, %c0_21], %51 {strides = array<i32>} : memref<8x1xf32, #tpu.memory_space<vmem>>, vector<8x1xf32>,
    %c0_22 = arith.constant 0 : index
    %c0_23 = arith.constant 0 : index
    %53 = vector.load %arg7[%c0_22, %c0_23] : memref<8x1xf32, #tpu.memory_space<vmem>>, vector<8x1xf32>
    tpu.vector_store %arg7[%c0_22, %c0_23], %41 {strides = array<i32>} : memref<8x1xf32, #tpu.memory_space<vmem>>, vector<8x1xf32>,
    %54 = arith.index_cast %arg1 : i32 to index
    %c0_24 = arith.constant 0 : index
    %c0_25 = arith.constant 0 : index
    %55 = vector.load %arg9[%54, %c0_24, %c0_25] : memref<2x1x8xf32, #tpu.memory_space<vmem>>, vector<1x1x8xf32>
    %56 = vector.shape_cast %55 : vector<1x1x8xf32> to vector<1x8xf32>
    %cst_26 = arith.constant dense<0xFF800000> : vector<8xf32>
    %57 = vector.multi_reduction <maximumf>, %34, %cst_26 [0] : vector<8x8xf32> to vector<8xf32>
    %58 = vector.shape_cast %57 : vector<8xf32> to vector<1x8xf32>
    %59 = arith.maximumf %56, %58 : vector<1x8xf32>
    %60 = vector.broadcast %59 : vector<1x8xf32> to vector<8x8xf32>
    %61 = arith.subf %34, %60 : vector<8x8xf32>
    %62 = math.exp %61 : vector<8x8xf32>
    %63 = arith.index_cast %arg1 : i32 to index
    %c0_27 = arith.constant 0 : index
    %c0_28 = arith.constant 0 : index
    %64 = vector.load %arg10[%63, %c0_27, %c0_28] : memref<2x1x8xf32, #tpu.memory_space<vmem>>, vector<1x1x8xf32>
    %65 = vector.shape_cast %64 : vector<1x1x8xf32> to vector<1x8xf32>
    %66 = arith.subf %56, %59 : vector<1x8xf32>
    %67 = math.exp %66 : vector<1x8xf32>
    %68 = arith.mulf %65, %67 : vector<1x8xf32>
    %cst_29 = arith.constant dense<0.000000e+00> : vector<8xf32>
    %69 = vector.multi_reduction <add>, %62, %cst_29 [0] : vector<8x8xf32> to vector<8xf32>
    %70 = vector.shape_cast %69 : vector<8xf32> to vector<1x8xf32>
    %71 = arith.addf %68, %70 : vector<1x8xf32>
    %72 = arith.index_cast %arg1 : i32 to index
    %c0_30 = arith.constant 0 : index
    %c0_31 = arith.constant 0 : index
    %73 = vector.load %arg10[%72, %c0_30, %c0_31] : memref<2x1x8xf32, #tpu.memory_space<vmem>>, vector<1x1x8xf32>
    %74 = vector.shape_cast %73 : vector<1x1x8xf32> to vector<1x8xf32>
    %75 = vector.shape_cast %71 : vector<1x8xf32> to vector<1x1x8xf32>
    tpu.vector_store %arg10[%72, %c0_30, %c0_31], %75 {strides = array<i32>} : memref<2x1x8xf32, #tpu.memory_space<vmem>>, vector<1x1x8xf32>,
    %76 = arith.index_cast %arg1 : i32 to index
    %c0_32 = arith.constant 0 : index
    %c0_33 = arith.constant 0 : index
    %77 = vector.load %arg9[%76, %c0_32, %c0_33] : memref<2x1x8xf32, #tpu.memory_space<vmem>>, vector<1x1x8xf32>
    %78 = vector.shape_cast %77 : vector<1x1x8xf32> to vector<1x8xf32>
    %79 = vector.shape_cast %59 : vector<1x8xf32> to vector<1x1x8xf32>
    tpu.vector_store %arg9[%76, %c0_32, %c0_33], %79 {strides = array<i32>} : memref<2x1x8xf32, #tpu.memory_space<vmem>>, vector<1x1x8xf32>,
    %c1_i32 = arith.constant 1 : i32
    %80 = arith.cmpi eq, %arg1, %c1_i32 : i32
    %81 = arith.extui %80 : i1 to i32
    %c0_i32_34 = arith.constant 0 : i32
    %82 = arith.cmpi ne, %81, %c0_i32_34 : i32
    scf.if %82 {
      %c0_40 = arith.constant 0 : index
      %c0_41 = arith.constant 0 : index
      %91 = vector.load %arg7[%c0_40, %c0_41] : memref<8x1xf32, #tpu.memory_space<vmem>>, vector<8x1xf32>
      %c0_42 = arith.constant 0 : index
      %c0_43 = arith.constant 0 : index
      %92 = vector.load %arg8[%c0_42, %c0_43] : memref<8x1xf32, #tpu.memory_space<vmem>>, vector<8x1xf32>
      %93 = math.log %92 : vector<8x1xf32>
      %94 = arith.addf %91, %93 : vector<8x1xf32>
      %cst_44 = arith.constant 0.000000e+00 : f32
      %95 = vector.broadcast %cst_44 : f32 to vector<8x1xf32>
      %96 = arith.select %11, %94, %95 : vector<8x1xi1>, vector<8x1xf32>
      %c0_45 = arith.constant 0 : index
      %c0_46 = arith.constant 0 : index
      %97 = vector.load %arg11[%c0_45, %c0_46] : memref<1x1xf32, #tpu.memory_space<vmem>>, vector<1x1xf32>
      %cst_47 = arith.constant dense<0.000000e+00> : vector<1xf32>
      %98 = vector.multi_reduction <add>, %96, %cst_47 [0] : vector<8x1xf32> to vector<1xf32>
      %99 = vector.shape_cast %98 : vector<1xf32> to vector<1x1xf32>
      %100 = arith.addf %97, %99 : vector<1x1xf32>
      %c0_48 = arith.constant 0 : index
      %c0_49 = arith.constant 0 : index
      %101 = vector.load %arg11[%c0_48, %c0_49] : memref<1x1xf32, #tpu.memory_space<vmem>>, vector<1x1xf32>
      tpu.vector_store %arg11[%c0_48, %c0_49], %100 {strides = array<i32>} : memref<1x1xf32, #tpu.memory_space<vmem>>, vector<1x1xf32>,
    } else {
    }
    %c1_i32_35 = arith.constant 1 : i32
    %83 = arith.cmpi eq, %arg0, %c1_i32_35 : i32
    %84 = arith.extui %83 : i1 to i32
    %c0_i32_36 = arith.constant 0 : i32
    %85 = arith.cmpi ne, %84, %c0_i32_36 : i32
    scf.if %85 {
      %91 = arith.index_cast %arg1 : i32 to index
      %c0_40 = arith.constant 0 : index
      %c0_41 = arith.constant 0 : index
      %92 = vector.load %arg9[%91, %c0_40, %c0_41] : memref<2x1x8xf32, #tpu.memory_space<vmem>>, vector<1x1x8xf32>
      %93 = vector.shape_cast %92 : vector<1x1x8xf32> to vector<1x8xf32>
      %94 = arith.index_cast %arg1 : i32 to index
      %c0_42 = arith.constant 0 : index
      %c0_43 = arith.constant 0 : index
      %95 = vector.load %arg10[%94, %c0_42, %c0_43] : memref<2x1x8xf32, #tpu.memory_space<vmem>>, vector<1x1x8xf32>
      %96 = vector.shape_cast %95 : vector<1x1x8xf32> to vector<1x8xf32>
      %97 = math.log %96 : vector<1x8xf32>
      %98 = arith.addf %93, %97 : vector<1x8xf32>
      %cst_44 = arith.constant 0.000000e+00 : f32
      %99 = vector.broadcast %cst_44 : f32 to vector<1x8xf32>
      %100 = arith.select %13, %98, %99 : vector<1x8xi1>, vector<1x8xf32>
      %c0_45 = arith.constant 0 : index
      %c0_46 = arith.constant 0 : index
      %101 = vector.load %arg11[%c0_45, %c0_46] : memref<1x1xf32, #tpu.memory_space<vmem>>, vector<1x1xf32>
      %cst_47 = arith.constant dense<0.000000e+00> : vector<1xf32>
      %102 = vector.multi_reduction <add>, %100, %cst_47 [1] : vector<1x8xf32> to vector<1xf32>
      %103 = vector.shape_cast %102 : vector<1xf32> to vector<1x1xf32>
      %104 = arith.addf %101, %103 : vector<1x1xf32>
      %c0_48 = arith.constant 0 : index
      %c0_49 = arith.constant 0 : index
      %105 = vector.load %arg11[%c0_48, %c0_49] : memref<1x1xf32, #tpu.memory_space<vmem>>, vector<1x1xf32>
      tpu.vector_store %arg11[%c0_48, %c0_49], %104 {strides = array<i32>} : memref<1x1xf32, #tpu.memory_space<vmem>>, vector<1x1xf32>,
    } else {
    }
    %c1_i32_37 = arith.constant 1 : i32
    %86 = arith.cmpi eq, %arg0, %c1_i32_37 : i32
    %c1_i32_38 = arith.constant 1 : i32
    %87 = arith.cmpi eq, %arg1, %c1_i32_38 : i32
    %88 = arith.andi %86, %87 : i1
    %89 = arith.extui %88 : i1 to i32
    %c0_i32_39 = arith.constant 0 : i32
    %90 = arith.cmpi ne, %89, %c0_i32_39 : i32
    scf.if %90 {
      %c0_40 = arith.constant 0 : index
      %c0_41 = arith.constant 0 : index
      %91 = vector.load %arg11[%c0_40, %c0_41] : memref<1x1xf32, #tpu.memory_space<vmem>>, vector<1x1xf32>
      %cst_42 = arith.constant 5.000000e-01 : f32
      %92 = vector.broadcast %cst_42 : f32 to vector<1x1xf32>
      %93 = arith.mulf %92, %91 : vector<1x1xf32>
      %94 = arith.sitofp %0 : i32 to f32
      %95 = vector.broadcast %94 : f32 to vector<1x1xf32>
      %96 = arith.divf %93, %95 : vector<1x1xf32>
      %c0_43 = arith.constant 0 : index
      %c0_44 = arith.constant 0 : index
      %97 = vector.load %arg6[%c0_43, %c0_44] : memref<1x1xf32, #tpu.memory_space<vmem>>, vector<1x1xf32>
      tpu.vector_store %arg6[%c0_43, %c0_44], %96 {strides = array<i32>} : memref<1x1xf32, #tpu.memory_space<vmem>>, vector<1x1xf32>,
    } else {
    }
    return
  }
  func.func @transform_0(%arg0: i32, %arg1: i32, %arg2: memref<1xi32, #tpu.memory_space<smem>>, %arg3: memref<1xf32, #tpu.memory_space<smem>>) -> (i32, i32) {
    %c0_i32 = arith.constant 0 : i32
    %c0_i32_0 = arith.constant 0 : i32
    return %arg0, %c0_i32 : i32, i32
  }
  func.func @transform_1(%arg0: i32, %arg1: i32, %arg2: memref<1xi32, #tpu.memory_space<smem>>, %arg3: memref<1xf32, #tpu.memory_space<smem>>) -> (i32, i32) {
    %c0_i32 = arith.constant 0 : i32
    %c0_i32_0 = arith.constant 0 : i32
    return %arg1, %c0_i32 : i32, i32
  }
  func.func @transform_2(%arg0: i32, %arg1: i32, %arg2: memref<1xi32, #tpu.memory_space<smem>>, %arg3: memref<1xf32, #tpu.memory_space<smem>>) -> (i32, i32) {
    %c0_i32 = arith.constant 0 : i32
    %c0_i32_0 = arith.constant 0 : i32
    %c0_i32_1 = arith.constant 0 : i32
    return %c0_i32, %c0_i32_0 : i32, i32
  }
}

</mosaic_0001>

<bundles_post_ra>
// kernel: tpu_custom_call.1
= control target key start
LH: loop header
LB: loop body
LE: loop exit
PB: predicated region body
PF: predicated region fallthrough
CT: control target
= control target key end

     0   :  { %s1233_s0 = inlined_call_operand.<no memory space> [shape: s32[1], index: 0, kind: input, shape index: {}]   ;;  %s1234_s1 = inlined_call_operand.<no memory space> [shape: f32[1], index: 1, kind: input, shape index: {}]   ;;  %s1235_s2 = inlined_call_operand.hbm [shape: f32[16,32], index: 2, kind: input, shape index: {}]   ;;  %s1236_s3 = inlined_call_operand.hbm [shape: f32[16,32], index: 3, kind: input, shape index: {}]   ;;  %s1237_s4 = inlined_call_operand.hbm [shape: f32[1,1], index: 4, kind: output, shape index: {}]  }
   0x1   :  { %1240 = sst [smem:[#allocation19_spill]] %s1235_s2 }
   0x2   :  { %9 = sst [smem:[#allocation8]] %s1233_s0 }
   0x3   :  { %10 = sst [smem:[#allocation9]] %s1234_s1 }
   0x4   :  { %11 = vsyncpa [#allocation11], 0 }
   0x5   :  { %13 = vsyncpa [#allocation11 + $0x1], 0 }
   0x6   :  { %14 = vsyncpa [#allocation14], 0 }
   0x7   :  { %16 = vsyncpa [#allocation14 + $0x1], 0 }
   0x8   :  { %17 = vsyncpa [#allocation12], 0  ;;  %s935_s19 = smov 0   ;;  %s937_s20 = smov 0  }
   0x9   :  { %s939_s21 = smov 0   ;;  %s941_s22 = smov 0  }
   0xa   :  { %s943_s23 = smov 0   ;;  %s945_s0 = smov 0  }
   0xb   :  { %s947_s24 = smov 0   ;;  %s949_s1 = smov 0  }
   0xc   :  { %s951_s25 = smov 0   ;;  %s953_s26 = smov 0  }
   0xd   :  { %s955_s27 = smov 0  }
   0xe LB: > { %s1239_s28 = sadd.s32 4294967295, %s891_s27   ;;  %s35_s29 = sadd.s32 1, %s887_s26  ;;  %s891_s27 = sphi %s955_s27, %s23_s27   ;;  %s887_s26 = sphi %s953_s26, %s1266_s26   ;;  %s883_s25 = sphi %s951_s25, %s1265_s25   ;;  %s879_s1 = sphi %s949_s1, %s1264_s1   ;;  %s875_s24 = sphi %s947_s24, %s1263_s24   ;;  %s871_s0 = sphi %s945_s0, %s1262_s0   ;;  %s867_s23 = sphi %s943_s23, %s1261_s23   ;;  %s863_s22 = sphi %s941_s22, %s1260_s22   ;;  %s859_s21 = sphi %s939_s21, %s1259_s21   ;;  %s855_s20 = sphi %s937_s20, %s1258_s20   ;;  %s851_s19 = sphi %s935_s19, %s1257_s19  }
   0xf   : > { %p49_p0 = scmp.ne.s32.totalorder %s871_s0, %s867_s23  ;;  %p50_p1 = scmp.eq.s32.totalorder %s891_s27, 0 }
  0x10   : > { %p55_p2 = scmp.ne.s32.totalorder %s867_s23, %s863_s22  ;;  %p996_p3 = scmp.eq.s32.totalorder %s1239_s28, 0 }
  0x11   : > { %p51_p4 = por %p50_p1, %p49_p0  ;;  %p1238_p5 = scmp.lt.s32.totalorder %s891_s27, 4 }
  0x12   : > { %p1005_p6 = por %p996_p3, %p55_p2  ;;  %s126_s6 = sand.u32 1, %s871_s0  }
  0x13   : > { %s556_s7 = sshll.u32 %s126_s6, 3  ;;  %s557_s8 = sshll.u32 %s887_s26, 7 }
  0x14   : > { %s1243_s2 = sld [smem:[#allocation19_spill]]  ;;  %s130_s12 = scalar_lea.vmem [#allocation10], %s556_s7 }
  0x15   : > { %s137_s13 = sshll.u32 %s130_s12, 4  ;;  %p1016_p7 = pnand %p1238_p5, %p51_p4  ;;  %s138_s13 = int_to_ptr.vmem [resolvable:$true] %s137_s13 }
  0x16   : > { %p560_p8 = scmp.ge.s32.totalorder %s891_s27, 1  ;;  %p160_p9 = scmp.lt.s32.totalorder %s891_s27, 5 }
  0x17   : > { %s127_s15 = scalar_lea.sflag [#allocation11], %s126_s6  ;;  %p715_p10 = pneg %p1016_p7 }
  0x18   : > { %s726_s16 = scalar_lea.vmem %s138_s13, 128  ;;  %s893_s17 = smov [#allocation10]  }
  0x19   : > { %p727_p11 = scmp.ne.s32.totalorder %s138_s13, %s726_s16  ;;  %s731_s18 = sshll.u32 %s893_s17, 4  ;;  %s732_s18 = int_to_ptr.vmem [resolvable:$false] %s731_s18 }
  0x1a   : > { %s135_s11 = scalar_lea.hbm %s1243_s2, %s557_s8  ;;  %s733_s22 = scalar_lea.vmem %s732_s18, 256 }
  0x1b   : > { %p729_p12 = pnand %p727_p11, %p715_p10  ;;  %p734_p0 = scmp.lt.s32.totalorder %s138_s13, %s732_s18 }
  0x1c   : > { %p735_p2 = scmp.lt.s32.totalorder %s733_s22, %s726_s16 }
  0x1d   : > { %p730_p13 = pneg %p729_p12 }
  0x1e   : > { %p736_p4 = por %p735_p2, %p734_p0 }
  0x20   : > { %p737_p5 = pnand %p736_p4, %p730_p13 }
  0x22   : > { %740 = shalt.err (!%p737_p5)
}
  0x23   : > { %594 = dma.hbm_to_vmem [thread:$0]  (!%p1016_p7), %s135_s11, 128, %s138_s13, %s127_s15  }
  0x24   : > { %p1030_p5 = pnand %p560_p8, %p160_p9  ;;  %s42_s7 = sadd.s32 1, %s871_s0 }
  0x25   : > { %s32_s8 = sadd.s32 1, %s883_s25  ;;  %s68_s9 = sadd.s32 1, %s859_s21 }
  0x26   : > { %p33_p10 = scmp.ge.s32.totalorder %s32_s8, 2  ;;  %p75_p11 = scmp.ne.s32.totalorder %s859_s21, %s855_s20 }
  0x27   : > { %p81_p12 = scmp.ne.s32.totalorder %s855_s20, %s851_s19  ;;  %s144_s11 = sand.u32 1, %s859_s21  }
  0x28   : > { %s1268_s8 = smov (%p33_p10, %s32_s8), 0  ;;  %s1270_s29 = smov (!%p33_p10, %s35_s29), %s887_s26 }
  0x29   : > { %s65_s10 = ssub.s32 %s883_s25, %s1268_s8  ;;  %p37_p7 = scmp.ge.s32.totalorder %s1270_s29, 2 }
  0x2a   : > { %p66_p8 = scmp.eq.s32.totalorder %s65_s10, 0  ;;  %p1051_p9 = por %p75_p11, %p50_p1 }
  0x2b   : > { %p1057_p13 = por %p81_p12, %p996_p3  ;;  %s1272_s29 = smov (%p37_p7, %s1270_s29), 0 }
  0x2c   : > { %s1064_s13 = scalar_select %p66_p8, %s859_s21, %s68_s9  }
  0x2d   : > { %s39_s14 = ssub.s32 %s887_s26, %s1272_s29  ;;  %s558_s15 = sshll.u32 %s144_s11, 3 }
  0x2e   : > { %p40_p0 = scmp.eq.s32.totalorder %s39_s14, 0  ;;  %s559_s16 = sshll.u32 %s883_s25, 7 }
  0x2f   : > { %s148_s17 = scalar_lea.vmem [#allocation13], %s558_s15  ;;  %s153_s28 = scalar_lea.hbm %s1236_s3, %s559_s16 }
  0x30   : > { %s155_s18 = sshll.u32 %s148_s17, 4  ;;  %p1248_p1 = scmp.lt.s32.totalorder %s891_s27, 4  ;;  %s156_s18 = int_to_ptr.vmem [resolvable:$true] %s155_s18 }
  0x31   : > { %s1070_s22 = scalar_select %p40_p0, %s871_s0, %s42_s7  }
  0x32   : > { %p1079_p3 = pnand %p1248_p1, %p1051_p9  ;;  %s145_s9 = scalar_lea.sflag [#allocation14], %s144_s11 }
  0x33   : > { %s754_s14 = scalar_lea.vmem %s156_s18, 128  ;;  %s894_s7 = smov [#allocation13]  }
  0x34   : > { %p743_p2 = pneg %p1079_p3  ;;  %p755_p4 = scmp.ne.s32.totalorder %s156_s18, %s754_s14 }
  0x35   : > { %s759_s15 = sshll.u32 %s894_s7, 4  ;;  %s760_s15 = int_to_ptr.vmem [resolvable:$false] %s759_s15 }
  0x36   : > { %p757_p10 = pnand %p755_p4, %p743_p2  ;;  %s761_s17 = scalar_lea.vmem %s760_s15, 256 }
  0x37   : > { %p762_p12 = scmp.lt.s32.totalorder %s156_s18, %s760_s15  ;;  %p763_p7 = scmp.lt.s32.totalorder %s761_s17, %s754_s14 }
  0x38   : > { %p758_p11 = pneg %p757_p10 }
  0x39   : > { %p764_p8 = por %p763_p7, %p762_p12 }
  0x3b   : > { %p765_p0 = pnand %p764_p8, %p758_p11 }
  0x3d   : > { %768 = shalt.err (!%p765_p0)
}
  0x3e   : > { %597 = dma.hbm_to_vmem [thread:$0]  (!%p1079_p3), %s153_s28, 128, %s156_s18, %s145_s9  }
  0x3f   : > { %164 = sbr.rel (%p1030_p5) target bundleno = 1141 (0x475), region = 28  ;;  %s166_s11 = sand.u32 (!%p1030_p5), 1, %s867_s23  }
  0x40   : > { %s1090_s12 = sshll.u32 (!%p1030_p5), %s166_s11, 3  ;;  %s167_s16 = scalar_lea.sflag (!%p1030_p5), [#allocation11], %s166_s11 }
  0x41   : > { %s170_s10 = scalar_lea.vmem (!%p1030_p5), [#allocation10], %s1090_s12 }
  0x44   : > { %838 = dma.done.wait (%p1005_p6), %s167_s16, 128  }
  0x45   : > { %840 = vsyncadd (%p1005_p6), %s167_s16, 4294967168  ;;  %s175_s2 = sand.u32 1, %s855_s20  }
  0x46   : > { %s1098_s28 = sshll.u32 %s175_s2, 3  ;;  %s176_s6 = scalar_lea.sflag [#allocation14], %s175_s2 }
  0x47   : > { %s179_s18 = scalar_lea.vmem [#allocation13], %s1098_s28 }
  0x48   : > { %842 = dma.done.wait (%p1057_p13), %s176_s6, 128  }
  0x49   : > { %844 = vsyncadd (%p1057_p13), %s176_s6, 4294967168  ;;  %s563_s30 = sshll.u32 %s879_s1, 3  ;;  %v203_v0 = vlaneseq  ;;  %s564_s5 = sshll.u32 %s875_s24, 3 }
  0x4a   : > { %s1107_s9 = sld [smem:[#allocation8]]  ;;  %v205_v1 = vstv %s563_s30  ;;  %v210_v2 = vstv %s564_s5  ;;  %p215_p6 = scmp.eq.s32.totalorder %s879_s1, 0 }
  0x4b   : > { %s1110_s14 = sld [smem:[#allocation9]]  ;;  %v1112_v3 = vshrl.u32 %v203_v0, 7  ;;  %v209_v4 = vand.u32 127, %v203_v0  ;;  %p216_p5 = scmp.eq.s32.totalorder %s875_s24, 0 }
  0x4d   : > { %v206_v5 = vadd.s32 %v205_v1, %v1112_v3  ;;  %v211_v6 = vadd.s32 %v210_v2, %v209_v4  ;;  %p217_p9 = pnand %p216_p5, %p215_p6 }
  0x4f   : > { %220 = sbr.rel (%p217_p9) target bundleno = 86 (0x56), region = 40 }
  0x50   : > { %v212_v7 = vstv %s1107_s9 }
  0x51   : > { %vm1117_vm0 = vcmp.lt.s32.totalorder %v206_v5, %v212_v7  ;;  %vm1121_vm1 = vcmp.lt.s32.totalorder %v211_v6, %v212_v7 }
  0x54   : > { %vm221_vm2 = vcmask 0   ;;  %v895_v10 = vmov 0.0  }
  0x55   : > { %222 = vst.msk [vmem:[#allocation6] sm:$0x1] %vm221_vm2, %v895_v10 }
  0x56 PF: > { %p565_p13 = scmp.ne.s32.totalorder %s875_s24, 0 }
  0x58   : > { %225 = sbr.rel (%p565_p13) target bundleno = 95 (0x5f), region = 44 }
  0x5d   : > { %vm226_vm3 = vcmask 7168   ;;  %v896_v11 = vmov -1e+30   ;;  %v897_v12 = vmov 0.0  }
  0x5e   : > { %227 = vst.msk [vmem:[#allocation2] sm:$0xff] %vm226_vm3, %v896_v11  ;;  %228 = vst.msk [vmem:[#allocation3] sm:$0xff] %vm226_vm3, %v897_v12 }
  0x5f PF: > { %p566_p1 = scmp.ne.s32.totalorder %s879_s1, 0 }
  0x60   : > { %s232_s19 = scalar_lea.vmem (!%p566_p1), [#allocation4], %s875_s24  ;;  %s235_s7 = scalar_lea.vmem (!%p566_p1), [#allocation5], %s875_s24 }
  0x61   : > { %231 = sbr.rel (%p566_p1) target bundleno = 104 (0x68), region = 48 }
  0x66   : > { %vm233_vm4 = vcmask 57344   ;;  %v898_v13 = vmov -1e+30   ;;  %v899_v14 = vmov 0.0  }
  0x67   : > { %234 = vst.msk [vmem:[%s232_s19] sm:$0x1] %vm233_vm4, %v898_v13  ;;  %236 = vst.msk [vmem:[%s235_s7] sm:$0x1] %vm233_vm4, %v899_v14 }
  0x68 PF: > { %v238_v15 = vld [vmem:[%s179_s18] sm:$0xff]  ;;  %vm239_vm5 = vcmask 261120   ;;  %v900_v16 = vmov 0.0   ;;  %vm901_vm6 = vmmov 0   ;;  %v237_v17 = vld [vmem:[%s170_s10] sm:$0xff]  ;;  %v316_v18 = vstv %s1110_s14  ;;  %vm322_vm7 = vmand %vm1117_vm0, %vm1121_vm1  ;;  %p569_p3 = scmp.ne.s32.totalorder %s879_s1, %s875_s24 }
  0x69   : > { %578 = vmatprep.subr.mxu0 %v900_v16  ;;  %580 = vmatprep.mubr.msk.f32.mxu0 %vm901_vm6, %v900_v16 }
  0x6a   : > { %579 = vmatpush3.xpose.msk.msra.mxu0 %vm239_vm5, %v238_v15 }
  0x6d   : > { %581 = vmatmul.mubr.msk.f32.vlgmr.msra.gmra.mxu0 %vm239_vm5, %v237_v17 }
 0x12c   : > { %327 = sbr.rel (%p569_p3) target bundleno = 464 (0x1d0), region = 52 }
 0x12d   : > { %v312_v19 = vpop.f32.mrf.mxu0 }
 0x12e   : > { %v317_v20 = vmul.f32 %v316_v18, %v312_v19 }
 0x12f   : > { %v582_v21 = vpop.f32.mrf.mxu0 }
 0x130   : > { %v1138_v22 = vsel %vm322_vm7, %v317_v20, -1e+30 }
 0x131   : > { %vm328_vm8 = vcmp.eq.s32.totalorder %v1112_v3, %v209_v4  ;;  %vm331_vm9 = vcmask 64512   ;;  %v341_v32 = vld [vmem:[#allocation6] sm:$0x1]  ;;  %vm344_vm11 = vcmask 0  }
 0x132   : > { %vm329_vm10 = vmand %vm328_vm8, %vm1117_vm0 }
 0x133   : > { %v330_v23 = vsel %vm329_vm10, %v317_v20, 0.0 }
 0x134   : > { %v332_v24 = vsel %vm331_vm9, %v330_v23, 0.0 }
 0x135   : > { %333 = vadd.xlane.f32.xlu0 %v332_v24 }
 0x1be   : > { %v334_v25 = vpop.xlane.xlu0 %333 }
 0x1bf   : > { %v335_v26 = vrot.slane %v334_v25, 4 }
 0x1c1   : > { %v336_v27 = vadd.f32 %v335_v26, %v334_v25 }
 0x1c3   : > { %v337_v28 = vrot.slane %v336_v27, 2 }
 0x1c5   : > { %v338_v29 = vadd.f32 %v337_v28, %v336_v27 }
 0x1c7   : > { %v339_v30 = vrot.slane %v338_v29, 1 }
 0x1c9   : > { %v340_v31 = vadd.f32 %v339_v30, %v338_v29 }
 0x1cb   : > { %v342_v33 = vmul.f32 2.0, %v340_v31 }
 0x1cd   : > { %v343_v34 = vsub.f32 %v341_v32, %v342_v33 }
 0x1cf   : > { %345 = vst.msk [vmem:[#allocation6] sm:$0x1] %vm344_vm11, %v343_v34 }
 0x1d0 PF: > { %vm347_vm12 = vcmask 64512   ;;  %s1148_s15 = scalar_lea.vmem [#allocation4], %s875_s24  ;;  %v384_v42 = vsub.s32 0, %v1112_v3  ;;  %vm404_vm13 = vcmask 57344   ;;  %v902_v44 = vmov 0   ;;  %s1157_s17 = scalar_lea.vmem [#allocation5], %s875_s24 }
 0x1d1   : > { %v348_v35 = vsel %vm347_vm12, %v1138_v22, -inf  ;;  %v373_v41 = vld [vmem:[%s1148_s15] sm:$0x1]  ;;  %698 = vset.pattern.permute.xlu0 %v902_v44  ;;  %vm369_vm14 = vcmask 7168   ;;  %p407_p2 = scmp.eq.s32.totalorder %s875_s24, 1  ;;  %v360_v12 = vld [vmem:[#allocation3] sm:$0xff] }
 0x1d2   : > { %349 = vmax.xlane.f32.xlu0 %v348_v35  ;;  %v374_v36 = vrot.slane %v348_v35, 4  ;;  %v391_v57 = vld [vmem:[%s1157_s17] sm:$0x1]  ;;  %p570_p4 = scmp.ne.s32.totalorder %s875_s24, 1 }
 0x1d3   : > { %v346_v63 = vld [vmem:[#allocation2] sm:$0xff] }
 0x1d4   : > { %v375_v37 = vmax.f32 %v348_v35, %v374_v36 }
 0x1d6   : > { %v376_v38 = vrot.slane %v375_v37, 2 }
 0x1d8   : > { %v377_v39 = vmax.f32 %v375_v37, %v376_v38 }
 0x1da   : > { %v378_v40 = vrot.slane %v377_v39, 1 }
 0x1dc   : > { %v379_v43 = vmax.f32 %v377_v39, %v378_v40 }
 0x1de   : > { %v380_v45 = vmax.f32 %v373_v41, %v379_v43 }
 0x1e0   : > { %v385_v46 = vrot.slane %v380_v45, %v384_v42  ;;  %406 = vst.msk [vmem:[%s1148_s15] sm:$0x1] %vm404_vm13, %v380_v45  ;;  %v392_v49 = vsub.f32 %v373_v41, %v380_v45 }
 0x1e2   : > { %v387_v47 = vsub.f32 %v1138_v22, %v385_v46  ;;  %v393_v50 = vmul.f32 1.442695, %v392_v49 }
 0x1e4   : > { %v388_v48 = vmul.f32 1.442695, %v387_v47 }
 0x1e6   : > { %699 = vpow2.f32 %v388_v48 }
 0x1e7   : > { %701 = vpow2.f32 %v393_v50 }
 0x1f3   : > { %v700_v51 = vpop.eup %699 }
 0x1f4   : > { %v396_v52 = vsel %vm347_vm12, %v700_v51, 0.0  ;;  %v702_v56 = vpop.eup %701 }
 0x1f5   : > { %v397_v53 = vrot.slane %v396_v52, 4  ;;  %v395_v59 = vmul.f32 %v702_v56, %v391_v57 }
 0x1f7   : > { %v398_v54 = vadd.f32 %v397_v53, %v396_v52 }
 0x1f9   : > { %v399_v55 = vrot.slane %v398_v54, 2 }
 0x1fb   : > { %v400_v58 = vadd.f32 %v399_v55, %v398_v54 }
 0x1fd   : > { %v401_v60 = vrot.slane %v400_v58, 1 }
 0x1ff   : > { %v402_v61 = vadd.f32 %v401_v60, %v400_v58 }
 0x201   : > { %v403_v62 = vadd.f32 %v402_v61, %v395_v59 }
 0x203   : > { %405 = vst.msk [vmem:[%s1157_s17] sm:$0x1] %vm404_vm13, %v403_v62 }
 0x25b   : > { %v350_v0 = vpop.xlane.xlu0 %349 }
 0x25c   : > { %v351_v1 = vmax.f32 %v346_v63, %v350_v0 }
 0x25e   : > { %v361_v2 = vsub.f32 %v346_v63, %v351_v1  ;;  %371 = vst.msk [vmem:[#allocation2] sm:$0xff] %vm369_vm14, %v351_v1  ;;  %354 = vperm.xlu0 %698, %v351_v1  }
 0x260   : > { %v362_v10 = vmul.f32 1.442695, %v361_v2 }
 0x2d9   : > { %v355_v3 = vpop.permute.xlu0 %354 }
 0x2da   : > { %v357_v4 = vsub.f32 %v1138_v22, %v355_v3 }
 0x2dc   : > { %v358_v5 = vmul.f32 1.442695, %v357_v4 }
 0x2de   : > { %703 = vpow2.f32 %v358_v5 }
 0x2df   : > { %705 = vpow2.f32 %v362_v10 }
 0x2eb   : > { %v704_v6 = vpop.eup %703 }
 0x2ec   : > { %v365_v7 = vsel %vm347_vm12, %v704_v6, 0.0  ;;  %v706_v11 = vpop.eup %705 }
 0x2ed   : > { %366 = vadd.xlane.f32.xlu1 %v365_v7  ;;  %v364_v13 = vmul.f32 %v706_v11, %v360_v12 }
 0x375   : > { %410 = sbr.rel (%p570_p4) target bundleno = 932 (0x3a4), region = 56 }
 0x376   : > { %v367_v14 = vpop.xlane.xlu1 %366 }
 0x377   : > { %v368_v15 = vadd.f32 %v367_v14, %v364_v13 }
 0x379   : > { %370 = vst.msk [vmem:[#allocation3] sm:$0xff] %vm369_vm14, %v368_v15 }
 0x37a   : > { %v411_v18 = vld [vmem:[#allocation2] sm:$0xff]  ;;  %v417_v28 = vld [vmem:[#allocation6] sm:$0x1]  ;;  %vm426_vm15 = vcmask 0  }
 0x380   : > { %v412_v16 = vld [vmem:[#allocation3] sm:$0xff] }
 0x381   : > { %707 = vlog2.f32 %v412_v16 }
 0x38e   : > { %v708_v17 = vpop.eup %707 }
 0x38f   : > { %v414_v19 = vmul.f32 0.6931472, %v708_v17 }
 0x391   : > { %v415_v20 = vadd.f32 %v414_v19, %v411_v18 }
 0x393   : > { %v416_v21 = vsel %vm1117_vm0, %v415_v20, 0.0 }
 0x394   : > { %v418_v22 = vsel %vm369_vm14, %v416_v21, 0.0 }
 0x395   : > { %v419_v23 = vrot.slane %v418_v22, 4 }
 0x397   : > { %v420_v24 = vadd.f32 %v419_v23, %v418_v22 }
 0x399   : > { %v421_v25 = vrot.slane %v420_v24, 2 }
 0x39b   : > { %v422_v26 = vadd.f32 %v421_v25, %v420_v24 }
 0x39d   : > { %v423_v27 = vrot.slane %v422_v26, 1 }
 0x39f   : > { %v424_v29 = vadd.f32 %v423_v27, %v422_v26 }
 0x3a1   : > { %v425_v30 = vadd.f32 %v424_v29, %v417_v28 }
 0x3a3   : > { %427 = vst.msk [vmem:[#allocation6] sm:$0x1] %vm426_vm15, %v425_v30 }
 0x3a4 PF: > { %p428_p10 = scmp.eq.s32.totalorder %s879_s1, 1  ;;  %p571_p11 = scmp.ne.s32.totalorder %s879_s1, 1 }
 0x3a6   : > { %431 = sbr.rel (%p571_p11) target bundleno = 1101 (0x44d), region = 60 }
 0x3ab   : > { %v433_v8 = vld [vmem:[%s1157_s17] sm:$0x1]  ;;  %v438_v37 = vld [vmem:[#allocation6] sm:$0x1]  ;;  %vm443_vm0 = vcmask 0  }
 0x3ac   : > { %709 = vlog2.f32 %v433_v8  ;;  %v432_v32 = vld [vmem:[%s1148_s15] sm:$0x1] }
 0x3b9   : > { %v710_v31 = vpop.eup %709 }
 0x3ba   : > { %v435_v33 = vmul.f32 0.6931472, %v710_v31 }
 0x3bc   : > { %v436_v34 = vadd.f32 %v435_v33, %v432_v32 }
 0x3be   : > { %v437_v35 = vsel %vm1121_vm1, %v436_v34, 0.0 }
 0x3bf   : > { %v439_v36 = vsel %vm404_vm13, %v437_v35, 0.0 }
 0x3c0   : > { %440 = vadd.xlane.f32.xlu0 %v439_v36 }
 0x449   : > { %v441_v38 = vpop.xlane.xlu0 %440 }
 0x44a   : > { %v442_v39 = vadd.f32 %v441_v38, %v438_v37 }
 0x44c   : > { %444 = vst.msk [vmem:[#allocation6] sm:$0x1] %vm443_vm0, %v442_v39 }
 0x44d PF: > { %p445_p12 = pnand %p428_p10, %p407_p2 }
 0x44e   : > { %s451_s11 = scvt.s32.f32 (!%p445_p12), %s1107_s9 }
 0x44f   : > { %448 = sbr.rel (%p445_p12) target bundleno = 1126 (0x466), region = 64 }
 0x454   : > { %v452_v40 = vstv %s451_s11  ;;  %v449_v9 = vld [vmem:[#allocation6] sm:$0x1]  ;;  %vm455_vm1 = vcmask 0  }
 0x455   : > { %711 = vrcp.f32 %v452_v40  ;;  %v450_v41 = vmul.f32 0.5, %v449_v9 }
 0x462   : > { %v712_v42 = vpop.eup %711 }
 0x463   : > { %v454_v43 = vmul.f32 %v712_v42, %v450_v41 }
 0x465   : > { %456 = vst.msk [vmem:[#allocation15] sm:$0x1] %vm455_vm1, %v454_v43 }
 0x466 PF: > { %s1254_s12 = sadd.s32 4294967295, %s891_s27   ;;  %s903_s24 = smov [#allocation15]  }
 0x467   : > { %p1185_p7 = scmp.eq.s32.totalorder %s1254_s12, 3  ;;  %s464_s1 = sshll.u32 %s903_s24, 4  ;;  %s465_s1 = int_to_ptr.vmem [resolvable:$true] %s464_s1 }
 0x468   : > { %s769_s10 = scalar_lea.vmem %s465_s1, 16  ;;  %s775_s2 = scalar_lea.vmem %s465_s1, 32 }
 0x469   : > { %p770_p8 = scmp.ne.s32.totalorder %s465_s1, %s769_s10  ;;  %p776_p5 = scmp.lt.s32.totalorder %s465_s1, %s465_s1 }
 0x46a   : > { %p777_p9 = scmp.lt.s32.totalorder %s775_s2, %s769_s10 }
 0x46b   : > { %p771_p0 = pnand %p770_p8, %p1185_p7 }
 0x46c   : > { %p778_p13 = por %p777_p9, %p776_p5 }
 0x46d   : > { %p772_p6 = pneg %p771_p0 }
 0x46f   : > { %p779_p1 = pnand %p778_p13, %p772_p6 }
 0x471   : > { %782 = shalt.err (!%p779_p1)
}
 0x472   : > { %588 = dma.vmem_to_hbm [thread:$0]  (%p1185_p7), %s465_s1, 16, %s1237_s4, [#allocation12]  }
 0x473   : > { %846 = dma.done.wait (%p1185_p7), [#allocation12], 16  }
 0x474   : > { %848 = vsyncadd (%p1185_p7), [#allocation12], 4294967280 }
 0x475 PF: > { %s23_s27 = sadd.s32 1, %s891_s27   ;;  %s1256_s18 = smov %s1070_s22 }
 0x476   : > { %p20_p3 = scmp.ge.s32.totalorder %s23_s27, 6   ;;  %s1257_s19 = smov %s855_s20 }
 0x477   : > { %s1258_s20 = smov %s859_s21  ;;  %s1259_s21 = smov %s1064_s13 }
 0x478   : > { %s1260_s22 = smov %s867_s23  ;;  %s1261_s23 = smov %s871_s0 }
 0x479   : > { %s1262_s0 = smov %s1256_s18  ;;  %s1263_s24 = smov %s883_s25 }
 0x47a   : > { %s1264_s1 = smov %s887_s26  ;;  %s1265_s25 = smov %s1268_s8 }
 0x47b   : > { %s1266_s26 = smov %s1272_s29  ;;  %22 = sbr.rel (!%p20_p3) target bundleno = 14 (0xe), region = 110 }
 0x480   :  { %477 = vsyncpa [#allocation11], 1 }
 0x481   :  { %479 = vsyncpa [#allocation11 + $0x1], 1 }
 0x482   :  { %480 = vsyncpa [#allocation14], 1 }
 0x483   :  { %482 = vsyncpa [#allocation14 + $0x1], 1 }
 0x484   :  { %483 = vsyncpa [#allocation12], 1 }
 0x485   :  { %485 = vsyncpa [#allocation12 + $0x1], 1 }

</bundles_post_ra>
